<compile_context>
chip_gen: v7x
topology: tpu7x:2x2x1
jax: 0.10.0
libtpu: 0.0.40
codegen_flags: <defaults>
</compile_context>

<pallas_src>
import functools

import jax
import jax.numpy as jnp
from jax.experimental import pallas as pl
from jax.experimental.pallas import tpu as pltpu

LANE = 128


def _round_up(x, m):
    return ((x + m - 1) // m) * m


def _pad2d(a, rows, cols):
    r, c = a.shape
    return jnp.pad(a, ((0, rows - r), (0, cols - c)))


def _pick_row_tile(n_pad, bytes_per_elem=2, budget=32 << 20):
    """Largest {512,256,128}-row tile whose 2x-buffered A slab fits the budget."""
    tm = 512 if n_pad % 512 == 0 else (256 if n_pad % 256 == 0 else 128)
    while tm > 128 and 2 * tm * n_pad * bytes_per_elem > budget:
        tm //= 2
    return tm


def _vmem_limit(nbytes):
    return int(min(max(int(nbytes * 1.5) + (1 << 20), 4 << 20), 64 << 20))


# --------------------------- Pallas kernels ----------------------------------

def feat_matmul_kernel(x_ref, w_ref, o_ref):
    """o_tile = x_tile @ W   (bf16 operands, f32 MXU accumulation)."""
    o_ref[...] = jnp.dot(x_ref[...], w_ref[...],
                         preferred_element_type=jnp.float32).astype(o_ref.dtype)


def gcn_aggregate_kernel(a_ref, xw_ref, b_ref, o_ref, *, apply_relu):
    """o_tile = A_tile @ XW + b (optional ReLU); f32 accumulate + f32 epilogue."""
    acc = jnp.dot(a_ref[...], xw_ref[...], preferred_element_type=jnp.float32)
    acc = acc + b_ref[...]
    if apply_relu:
        acc = jnp.maximum(acc, 0.0)
    o_ref[...] = acc.astype(o_ref.dtype)


# --------------------------- pallas_call wrappers -----------------------------

def _feat_matmul(x, w, tm):
    n_pad, fin = x.shape
    fout = w.shape[1]
    footprint = 2 * (tm * fin * 2) + 2 * (fin * fout * 2) + 2 * (tm * fout * 2)
    return pl.pallas_call(
        feat_matmul_kernel,
        out_shape=jax.ShapeDtypeStruct((n_pad, fout), jnp.bfloat16),
        grid=(n_pad // tm,),
        in_specs=[pl.BlockSpec((tm, fin), lambda i: (i, 0)),
                  pl.BlockSpec((fin, fout), lambda i: (0, 0))],
        out_specs=pl.BlockSpec((tm, fout), lambda i: (i, 0)),
        compiler_params=pltpu.CompilerParams(
            dimension_semantics=("parallel",),
            vmem_limit_bytes=_vmem_limit(footprint)),
        cost_estimate=pl.CostEstimate(
            flops=2 * n_pad * fin * fout,
            transcendentals=0,
            bytes_accessed=2 * (n_pad * fin + fin * fout + n_pad * fout)),
    )(x, w)


def _gcn_aggregate(a, xw, b, tm, apply_relu, out_dtype):
    n_pad = a.shape[0]
    fout = xw.shape[1]
    out_elem = jnp.dtype(out_dtype).itemsize
    footprint = (2 * (tm * n_pad * 2) + 2 * (n_pad * fout * 2)
                 + 2 * (fout * 4) + 2 * (tm * fout * out_elem))
    kernel = functools.partial(gcn_aggregate_kernel, apply_relu=apply_relu)
    return pl.pallas_call(
        kernel,
        out_shape=jax.ShapeDtypeStruct((n_pad, fout), out_dtype),
        grid=(n_pad // tm,),
        in_specs=[pl.BlockSpec((tm, n_pad), lambda i: (i, 0)),   # stream A row-tiles
                  pl.BlockSpec((n_pad, fout), lambda i: (0, 0)),  # XW stays resident
                  pl.BlockSpec((1, fout), lambda i: (0, 0))],     # bias resident
        out_specs=pl.BlockSpec((tm, fout), lambda i: (i, 0)),
        compiler_params=pltpu.CompilerParams(
            dimension_semantics=("parallel",),
            vmem_limit_bytes=_vmem_limit(footprint)),
        cost_estimate=pl.CostEstimate(
            flops=2 * n_pad * n_pad * fout,
            transcendentals=0,
            bytes_accessed=(n_pad * n_pad * 2 + n_pad * fout * 2
                            + n_pad * fout * out_elem + fout * 4)),
    )(a, xw, b)


# --------------------------- host-side glue -----------------------------------

def build_normalized_adjacency(edge_index, num_nodes):
    """Dense A_hat = D^{-1/2} (A + I) D^{-1/2}, matching PyG gcn_norm.

    Uses add_remaining_self_loops semantics: a self-loop is only added for nodes
    that do not already have one.
    """
    src, dst = edge_index[0], edge_index[1]
    a = jnp.zeros((num_nodes, num_nodes), jnp.float32).at[dst, src].add(1.0)
    diag = jnp.diagonal(a)
    a = a + jnp.diag(jnp.where(diag == 0, 1.0, 0.0))
    deg = a.sum(axis=1)                               # in-degree incl. self-loop
    dinv = jnp.where(deg > 0, jax.lax.rsqrt(deg), 0.0)
    return (dinv[:, None] * a) * dinv[None, :]


def lamp_signature_encoder(x, edge_index, params):
    """forward: conv2( relu( conv1(x, A_hat) ), A_hat )  ->  [N, out_channels]."""
    n, fin = x.shape
    hid = params["w1"].shape[1]
    out_ch = params["w2"].shape[1]

    # Pad to TPU-friendly (lane-dense) shapes.
    n_pad = _round_up(n, LANE)
    fin_p = _round_up(fin, LANE)
    hid_p = _round_up(hid, LANE)
    out_p = _round_up(out_ch, LANE)
    tm = _pick_row_tile(n_pad)

    a_hat = build_normalized_adjacency(edge_index, n)
    a_pad = _pad2d(a_hat, n_pad, n_pad).astype(jnp.bfloat16)
    x_pad = _pad2d(x, n_pad, fin_p).astype(jnp.bfloat16)
    w1 = _pad2d(params["w1"], fin_p, hid_p).astype(jnp.bfloat16)
    b1 = _pad2d(params["b1"], 1, hid_p).astype(jnp.float32)
    w2 = _pad2d(params["w2"], hid_p, out_p).astype(jnp.bfloat16)
    b2 = _pad2d(params["b2"], 1, out_p).astype(jnp.float32)

    # Layer 1: h = relu(A_hat @ (x @ W1) + b1)   (h kept bf16 for the next MXU pass)
    xw1 = _feat_matmul(x_pad, w1, tm)
    h = _gcn_aggregate(a_pad, xw1, b1, tm, apply_relu=True, out_dtype=jnp.bfloat16)

    # Layer 2: out = A_hat @ (h @ W2) + b2
    hw2 = _feat_matmul(h, w2, tm)
    out = _gcn_aggregate(a_pad, hw2, b2, tm, apply_relu=False, out_dtype=jnp.float32)

    return out[:n, :out_ch]


def glorot(key, shape):
    fan_in, fan_out = shape
    limit = jnp.sqrt(6.0 / (fan_in + fan_out))
    return jax.random.uniform(key, shape, jnp.float32, -limit, limit)


def init_params(key, in_channels, out_channels):
    k1, k2 = jax.random.split(key, 2)
    hid = 2 * out_channels
    return {
        "w1": glorot(k1, (in_channels, hid)),
        "b1": jnp.zeros((1, hid), jnp.float32),
        "w2": glorot(k2, (hid, out_channels)),
        "b2": jnp.zeros((1, out_channels), jnp.float32),
    }


def reference_forward(x, edge_index, params):
    """Pure-JAX f32 reference of the PyTorch forward for a sanity check."""
    a = build_normalized_adjacency(edge_index, x.shape[0])
    h = jnp.maximum(a @ (x @ params["w1"]) + params["b1"], 0.0)
    return a @ (h @ params["w2"]) + params["b2"]


if __name__ == "__main__":
    key = jax.random.PRNGKey(0)
    k_x, k_e, k_p = jax.random.split(key, 3)

    num_nodes = 16
    in_channels = 8
    out_channels = 4
    num_edges = 24

    x = jax.random.normal(k_x, (num_nodes, in_channels), jnp.float32)
    edge_index = jax.random.randint(k_e, (2, num_edges), 0, num_nodes, jnp.int32)
    params = init_params(k_p, in_channels, out_channels)

    fwd = jax.jit(lamp_signature_encoder)
    out = fwd(x, edge_index, params)
    jax.block_until_ready(out)

    assert out.shape == (num_nodes, out_channels)
    assert bool(jnp.all(jnp.isfinite(out)))

    ref = reference_forward(x, edge_index, params)
    max_err = float(jnp.max(jnp.abs(out - ref)))
    assert max_err < 1e-1, f"kernel/reference mismatch: max abs err {max_err}"

    print("KERNEL_OK")
</pallas_src>

<mosaic_0001>
module attributes {stable_mosaic.version = 11 : i64} {
  func.func @feat_matmul_kernel(%arg0: i32, %arg1: memref<128x128xbf16, #tpu.memory_space<vmem>>, %arg2: memref<128x128xbf16, #tpu.memory_space<vmem>>, %arg3: memref<128x128xbf16, #tpu.memory_space<vmem>>) attributes {dimension_semantics = [#tpu.dimension_semantics<parallel>], iteration_bounds = array<i64: 1>, scalar_prefetch = 0 : i64, scratch_operands = 0 : i64, tpu.core_type = #tpu.core_type<tc>, window_params = [{transform_indices = @transform_0, window_bounds = array<i64: 128, 128>}, {pipeline_mode = #tpu.pipeline_mode<synchronous>, transform_indices = @transform_1, window_bounds = array<i64: 128, 128>}, {transform_indices = @transform_2, window_bounds = array<i64: 128, 128>}]} {
    %c0 = arith.constant 0 : index
    %c0_0 = arith.constant 0 : index
    %0 = vector.load %arg1[%c0, %c0_0] : memref<128x128xbf16, #tpu.memory_space<vmem>>, vector<128x128xbf16>
    %c0_1 = arith.constant 0 : index
    %c0_2 = arith.constant 0 : index
    %1 = vector.load %arg2[%c0_1, %c0_2] : memref<128x128xbf16, #tpu.memory_space<vmem>>, vector<128x128xbf16>
    %cst = arith.constant dense<0.000000e+00> : vector<128x128xf32>
    %2 = tpu.matmul %0, %1, %cst {dimension_numbers = #tpu.dot_dimension_numbers<[1], [0], [0], [1], [0, 0, 1, 1], [], []>} : vector<128x128xbf16>, vector<128x128xbf16>, vector<128x128xf32> -> vector<128x128xf32>
    %3 = arith.truncf %2 : vector<128x128xf32> to vector<128x128xbf16>
    %c0_3 = arith.constant 0 : index
    %c0_4 = arith.constant 0 : index
    %4 = vector.load %arg3[%c0_3, %c0_4] : memref<128x128xbf16, #tpu.memory_space<vmem>>, vector<128x128xbf16>
    tpu.vector_store %arg3[%c0_3, %c0_4], %3 {strides = array<i32>} : memref<128x128xbf16, #tpu.memory_space<vmem>>, vector<128x128xbf16>,
    return
  }
  func.func @transform_0(%arg0: i32) -> (i32, i32) {
    %c0_i32 = arith.constant 0 : i32
    %c0_i32_0 = arith.constant 0 : i32
    return %arg0, %c0_i32 : i32, i32
  }
  func.func @transform_1(%arg0: i32) -> (i32, i32) {
    %c0_i32 = arith.constant 0 : i32
    %c0_i32_0 = arith.constant 0 : i32
    %c0_i32_1 = arith.constant 0 : i32
    return %c0_i32, %c0_i32_0 : i32, i32
  }
  func.func @transform_2(%arg0: i32) -> (i32, i32) {
    %c0_i32 = arith.constant 0 : i32
    %c0_i32_0 = arith.constant 0 : i32
    return %arg0, %c0_i32 : i32, i32
  }
}

module attributes {stable_mosaic.version = 11 : i64} {
  func.func @gcn_aggregate_kernel(%arg0: i32, %arg1: memref<128x128xbf16, #tpu.memory_space<vmem>>, %arg2: memref<128x128xbf16, #tpu.memory_space<vmem>>, %arg3: memref<1x128xf32, #tpu.memory_space<vmem>>, %arg4: memref<128x128xbf16, #tpu.memory_space<vmem>>) attributes {dimension_semantics = [#tpu.dimension_semantics<parallel>], iteration_bounds = array<i64: 1>, scalar_prefetch = 0 : i64, scratch_operands = 0 : i64, tpu.core_type = #tpu.core_type<tc>, window_params = [{transform_indices = @transform_0, window_bounds = array<i64: 128, 128>}, {pipeline_mode = #tpu.pipeline_mode<synchronous>, transform_indices = @transform_1, window_bounds = array<i64: 128, 128>}, {pipeline_mode = #tpu.pipeline_mode<synchronous>, transform_indices = @transform_2, window_bounds = array<i64: 1, 128>}, {transform_indices = @transform_3, window_bounds = array<i64: 128, 128>}]} {
    %c0 = arith.constant 0 : index
    %c0_0 = arith.constant 0 : index
    %0 = vector.load %arg1[%c0, %c0_0] : memref<128x128xbf16, #tpu.memory_space<vmem>>, vector<128x128xbf16>
    %c0_1 = arith.constant 0 : index
    %c0_2 = arith.constant 0 : index
    %1 = vector.load %arg2[%c0_1, %c0_2] : memref<128x128xbf16, #tpu.memory_space<vmem>>, vector<128x128xbf16>
    %cst = arith.constant dense<0.000000e+00> : vector<128x128xf32>
    %2 = tpu.matmul %0, %1, %cst {dimension_numbers = #tpu.dot_dimension_numbers<[1], [0], [0], [1], [0, 0, 1, 1], [], []>} : vector<128x128xbf16>, vector<128x128xbf16>, vector<128x128xf32> -> vector<128x128xf32>
    %c0_3 = arith.constant 0 : index
    %c0_4 = arith.constant 0 : index
    %3 = vector.load %arg3[%c0_3, %c0_4] : memref<1x128xf32, #tpu.memory_space<vmem>>, vector<1x128xf32>
    %4 = vector.broadcast %3 : vector<1x128xf32> to vector<128x128xf32>
    %5 = arith.addf %2, %4 : vector<128x128xf32>
    %cst_5 = arith.constant 0.000000e+00 : f32
    %6 = vector.broadcast %cst_5 : f32 to vector<128x128xf32>
    %7 = arith.maximumf %5, %6 : vector<128x128xf32>
    %8 = arith.truncf %7 : vector<128x128xf32> to vector<128x128xbf16>
    %c0_6 = arith.constant 0 : index
    %c0_7 = arith.constant 0 : index
    %9 = vector.load %arg4[%c0_6, %c0_7] : memref<128x128xbf16, #tpu.memory_space<vmem>>, vector<128x128xbf16>
    tpu.vector_store %arg4[%c0_6, %c0_7], %8 {strides = array<i32>} : memref<128x128xbf16, #tpu.memory_space<vmem>>, vector<128x128xbf16>,
    return
  }
  func.func @transform_0(%arg0: i32) -> (i32, i32) {
    %c0_i32 = arith.constant 0 : i32
    %c0_i32_0 = arith.constant 0 : i32
    return %arg0, %c0_i32 : i32, i32
  }
  func.func @transform_1(%arg0: i32) -> (i32, i32) {
    %c0_i32 = arith.constant 0 : i32
    %c0_i32_0 = arith.constant 0 : i32
    %c0_i32_1 = arith.constant 0 : i32
    return %c0_i32, %c0_i32_0 : i32, i32
  }
  func.func @transform_2(%arg0: i32) -> (i32, i32) {
    %c0_i32 = arith.constant 0 : i32
    %c0_i32_0 = arith.constant 0 : i32
    %c0_i32_1 = arith.constant 0 : i32
    return %c0_i32, %c0_i32_0 : i32, i32
  }
  func.func @transform_3(%arg0: i32) -> (i32, i32) {
    %c0_i32 = arith.constant 0 : i32
    %c0_i32_0 = arith.constant 0 : i32
    return %arg0, %c0_i32 : i32, i32
  }
}

module attributes {stable_mosaic.version = 11 : i64} {
  func.func @gcn_aggregate_kernel(%arg0: i32, %arg1: memref<128x128xbf16, #tpu.memory_space<vmem>>, %arg2: memref<128x128xbf16, #tpu.memory_space<vmem>>, %arg3: memref<1x128xf32, #tpu.memory_space<vmem>>, %arg4: memref<128x128xf32, #tpu.memory_space<vmem>>) attributes {dimension_semantics = [#tpu.dimension_semantics<parallel>], iteration_bounds = array<i64: 1>, scalar_prefetch = 0 : i64, scratch_operands = 0 : i64, tpu.core_type = #tpu.core_type<tc>, window_params = [{transform_indices = @transform_0, window_bounds = array<i64: 128, 128>}, {pipeline_mode = #tpu.pipeline_mode<synchronous>, transform_indices = @transform_1, window_bounds = array<i64: 128, 128>}, {pipeline_mode = #tpu.pipeline_mode<synchronous>, transform_indices = @transform_2, window_bounds = array<i64: 1, 128>}, {transform_indices = @transform_3, window_bounds = array<i64: 128, 128>}]} {
    %c0 = arith.constant 0 : index
    %c0_0 = arith.constant 0 : index
    %0 = vector.load %arg1[%c0, %c0_0] : memref<128x128xbf16, #tpu.memory_space<vmem>>, vector<128x128xbf16>
    %c0_1 = arith.constant 0 : index
    %c0_2 = arith.constant 0 : index
    %1 = vector.load %arg2[%c0_1, %c0_2] : memref<128x128xbf16, #tpu.memory_space<vmem>>, vector<128x128xbf16>
    %cst = arith.constant dense<0.000000e+00> : vector<128x128xf32>
    %2 = tpu.matmul %0, %1, %cst {dimension_numbers = #tpu.dot_dimension_numbers<[1], [0], [0], [1], [0, 0, 1, 1], [], []>} : vector<128x128xbf16>, vector<128x128xbf16>, vector<128x128xf32> -> vector<128x128xf32>
    %c0_3 = arith.constant 0 : index
    %c0_4 = arith.constant 0 : index
    %3 = vector.load %arg3[%c0_3, %c0_4] : memref<1x128xf32, #tpu.memory_space<vmem>>, vector<1x128xf32>
    %4 = vector.broadcast %3 : vector<1x128xf32> to vector<128x128xf32>
    %5 = arith.addf %2, %4 : vector<128x128xf32>
    %c0_5 = arith.constant 0 : index
    %c0_6 = arith.constant 0 : index
    %6 = vector.load %arg4[%c0_5, %c0_6] : memref<128x128xf32, #tpu.memory_space<vmem>>, vector<128x128xf32>
    tpu.vector_store %arg4[%c0_5, %c0_6], %5 {strides = array<i32>} : memref<128x128xf32, #tpu.memory_space<vmem>>, vector<128x128xf32>,
    return
  }
  func.func @transform_0(%arg0: i32) -> (i32, i32) {
    %c0_i32 = arith.constant 0 : i32
    %c0_i32_0 = arith.constant 0 : i32
    return %arg0, %c0_i32 : i32, i32
  }
  func.func @transform_1(%arg0: i32) -> (i32, i32) {
    %c0_i32 = arith.constant 0 : i32
    %c0_i32_0 = arith.constant 0 : i32
    %c0_i32_1 = arith.constant 0 : i32
    return %c0_i32, %c0_i32_0 : i32, i32
  }
  func.func @transform_2(%arg0: i32) -> (i32, i32) {
    %c0_i32 = arith.constant 0 : i32
    %c0_i32_0 = arith.constant 0 : i32
    %c0_i32_1 = arith.constant 0 : i32
    return %c0_i32, %c0_i32_0 : i32, i32
  }
  func.func @transform_3(%arg0: i32) -> (i32, i32) {
    %c0_i32 = arith.constant 0 : i32
    %c0_i32_0 = arith.constant 0 : i32
    return %arg0, %c0_i32 : i32, i32
  }
}

</mosaic_0001>

<bundles_post_ra>
// kernel: lamp_signature_encoder.4
= control target key start
LH: loop header
LB: loop body
LE: loop exit
PB: predicated region body
PF: predicated region fallthrough
CT: control target
= control target key end

     0   :  { %s583_s1 = inlined_call_operand.vmem [shape: bf16[128,128], index: 1, kind: input, shape index: {}]   ;;  %s584_s0 = inlined_call_operand.vmem [shape: bf16[128,128], index: 0, kind: input, shape index: {}]   ;;  %s585_s2 = inlined_call_operand.vmem [shape: bf16[128,128], index: 2, kind: output, shape index: {}]  }
   0x1   :  { %v480_v0 = vld [vmem:[%s583_s1] sm:$0xff]   ;;  %v481_v1 = vld [vmem:[%s583_s1 + $0x8] sm:$0xff]   ;;  %v482_v2 = vld [vmem:[%s583_s1 + $0x10] sm:$0xff]  }
   0x2   :  { %432 = vmatprep.subr.bf16.mxu0 %v480_v0  ;;  %464 = vmatprep.subr.bf16.mxu1 %v480_v0  ;;  %v483_v3 = vld [vmem:[%s583_s1 + $0x18] sm:$0xff]   ;;  %v488_v4 = vld [vmem:[%s584_s0] sm:$0xff]   ;;  %v485_v7 = vld [vmem:[%s583_s1 + $0x28] sm:$0xff]  }
   0x3   :  { %433 = vmatpush3.bf16.msra.mxu0 %v480_v0  ;;  %472 = vmatpush3.bf16.msra.mxu1 %v480_v0  ;;  %v489_v5 = vld [vmem:[%s584_s0 + $0x20] sm:$0xff]   ;;  %v486_v8 = vld [vmem:[%s583_s1 + $0x30] sm:$0xff]   ;;  %v487_v9 = vld [vmem:[%s583_s1 + $0x38] sm:$0xff]  }
   0x4   :  { %434 = vmatprep.subr.bf16.mxu0 %v481_v1  ;;  %465 = vmatprep.subr.bf16.mxu1 %v481_v1  ;;  %v484_v6 = vld [vmem:[%s583_s1 + $0x20] sm:$0xff]   ;;  %v490_v10 = vld [vmem:[%s584_s0 + $0x8] sm:$0xff]   ;;  %v492_v12 = vld [vmem:[%s584_s0 + $0x10] sm:$0xff]  }
   0x5   :  { %448 = vmatprep.mubr.bf16.mxu0 %v488_v4  ;;  %456 = vmatprep.mubr.bf16.mxu1 %v489_v5  ;;  %v491_v11 = vld [vmem:[%s584_s0 + $0x28] sm:$0xff]   ;;  %v493_v13 = vld [vmem:[%s584_s0 + $0x30] sm:$0xff]   ;;  %v494_v14 = vld [vmem:[%s584_s0 + $0x18] sm:$0xff]  }
   0x6   :  { %v495_v15 = vld [vmem:[%s584_s0 + $0x38] sm:$0xff]  }
   0x7   :  { %435 = vmatpush3.bf16.msra.mxu0 %v481_v1  ;;  %473 = vmatpush3.bf16.msra.mxu1 %v481_v1 }
   0x8   :  { %436 = vmatprep.subr.bf16.mxu0 %v482_v2  ;;  %466 = vmatprep.subr.bf16.mxu1 %v482_v2 }
   0xb   :  { %437 = vmatpush3.bf16.msra.mxu0 %v482_v2  ;;  %474 = vmatpush3.bf16.msra.mxu1 %v482_v2 }
   0xc   :  { %438 = vmatprep.subr.bf16.mxu0 %v483_v3  ;;  %467 = vmatprep.subr.bf16.mxu1 %v483_v3 }
   0xf   :  { %439 = vmatpush3.bf16.msra.mxu0 %v483_v3  ;;  %475 = vmatpush3.bf16.msra.mxu1 %v483_v3 }
  0x10   :  { %440 = vmatprep.subr.bf16.mxu0 %v484_v6  ;;  %468 = vmatprep.subr.bf16.mxu1 %v484_v6 }
  0x13   :  { %441 = vmatpush3.bf16.msra.mxu0 %v484_v6  ;;  %476 = vmatpush3.bf16.msra.mxu1 %v484_v6 }
  0x14   :  { %442 = vmatprep.subr.bf16.mxu0 %v485_v7  ;;  %469 = vmatprep.subr.bf16.mxu1 %v485_v7 }
  0x17   :  { %443 = vmatpush3.bf16.msra.mxu0 %v485_v7  ;;  %477 = vmatpush3.bf16.msra.mxu1 %v485_v7 }
  0x18   :  { %444 = vmatprep.subr.bf16.mxu0 %v486_v8  ;;  %470 = vmatprep.subr.bf16.mxu1 %v486_v8 }
  0x1b   :  { %445 = vmatpush3.bf16.msra.mxu0 %v486_v8  ;;  %478 = vmatpush3.bf16.msra.mxu1 %v486_v8 }
  0x1c   :  { %446 = vmatprep.subr.bf16.mxu0 %v487_v9  ;;  %471 = vmatprep.subr.bf16.mxu1 %v487_v9 }
  0x1f   :  { %447 = vmatpush3.bf16.msra.mxu0 %v487_v9  ;;  %479 = vmatpush3.bf16.msra.mxu1 %v487_v9 }
  0x22   :  { %449 = vmatmul.mubr.bf16.vlgmr.msra.gmra.mrb[0].mxu0 %v490_v10  ;;  %457 = vmatmul.mubr.bf16.vlgmr.msra.gmra.mrb[0].mxu1 %v491_v11 }
  0x23   :  { %452 = vmatprep.mubr.bf16.mxu0 %v492_v12  ;;  %460 = vmatprep.mubr.bf16.mxu1 %v493_v13 }
  0x2a   :  { %453 = vmatmul.mubr.bf16.gmra.mrb[4].mxu0 %v494_v14  ;;  %461 = vmatmul.mubr.bf16.gmra.mrb[4].mxu1 %v495_v15 }
  0xf5   :  { %v450_v16 = vpop.f32.mrb[0].mxu0  ;;  %v458_v17 = vpop.f32.mrb[0].mxu1 }
  0xf6   :  { %v174_v18 = vpop.f32.mrb[1].mxu0  ;;  %v206_v19 = vpop.f32.mrb[1].mxu1 }
  0xf7   :  { %v451_v20 = vpop.f32.mrb[2].mxu0  ;;  %v459_v21 = vpop.f32.mrb[2].mxu1 }
  0xf8   :  { %v377_v22 = vpack.c.bf16 %v451_v20, %v450_v16  ;;  %v397_v23 = vpack.c.bf16 %v459_v21, %v458_v17  ;;  %v177_v24 = vpop.f32.mrb[3].mxu0  ;;  %v209_v25 = vpop.f32.mrb[3].mxu1 }
  0xf9   :  { %v372_v26 = vpack.c.bf16 %v177_v24, %v174_v18  ;;  %v392_v27 = vpack.c.bf16 %v209_v25, %v206_v19 }
  0xfa   :  { %409 = vst [vmem:[%s585_s2 + $0x8] sm:$0xff] %v377_v22   ;;  %413 = vst [vmem:[%s585_s2 + $0x28] sm:$0xff] %v397_v23  }
  0xfb   :  { %373 = vst [vmem:[%s585_s2] sm:$0xff] %v372_v26   ;;  %412 = vst [vmem:[%s585_s2 + $0x20] sm:$0xff] %v392_v27  }
  0xfd   :  { %v454_v28 = vpop.f32.mrb[4].mxu0  ;;  %v462_v29 = vpop.f32.mrb[4].mxu1 }
  0xfe   :  { %v190_v30 = vpop.f32.mrb[5].mxu0  ;;  %v222_v31 = vpop.f32.mrb[5].mxu1 }
  0xff   :  { %v455_v32 = vpop.f32.mrb[6].mxu0  ;;  %v463_v33 = vpop.f32.mrb[6].mxu1 }
 0x100   :  { %v387_v34 = vpack.c.bf16 %v455_v32, %v454_v28  ;;  %v407_v35 = vpack.c.bf16 %v463_v33, %v462_v29  ;;  %v193_v36 = vpop.f32.mrb[7].mxu0  ;;  %v225_v37 = vpop.f32.mrb[7].mxu1 }
 0x101   :  { %v382_v38 = vpack.c.bf16 %v193_v36, %v190_v30  ;;  %v402_v39 = vpack.c.bf16 %v225_v37, %v222_v31 }
 0x102   :  { %411 = vst [vmem:[%s585_s2 + $0x18] sm:$0xff] %v387_v34   ;;  %415 = vst [vmem:[%s585_s2 + $0x38] sm:$0xff] %v407_v35  }
 0x103   :  { %410 = vst [vmem:[%s585_s2 + $0x10] sm:$0xff] %v382_v38   ;;  %414 = vst [vmem:[%s585_s2 + $0x30] sm:$0xff] %v402_v39  }

// kernel: lamp_signature_encoder.5
= control target key start
LH: loop header
LB: loop body
LE: loop exit
PB: predicated region body
PF: predicated region fallthrough
CT: control target
= control target key end

     0   :  { %s618_s1 = inlined_call_operand.vmem [shape: bf16[128,128], index: 1, kind: input, shape index: {}]   ;;  %s619_s0 = inlined_call_operand.vmem [shape: bf16[128,128], index: 0, kind: input, shape index: {}]   ;;  %s620_s2 = inlined_call_operand.vmem [shape: f32[1,128], index: 2, kind: input, shape index: {}]   ;;  %s621_s3 = inlined_call_operand.vmem [shape: bf16[128,128], index: 3, kind: output, shape index: {}]  }
   0x1   :  { %v507_v0 = vld [vmem:[%s618_s1] sm:$0xff]   ;;  %v508_v1 = vld [vmem:[%s618_s1 + $0x8] sm:$0xff]   ;;  %v509_v2 = vld [vmem:[%s618_s1 + $0x10] sm:$0xff]  }
   0x2   :  { %459 = vmatprep.subr.bf16.mxu0 %v507_v0  ;;  %491 = vmatprep.subr.bf16.mxu1 %v507_v0  ;;  %v510_v3 = vld [vmem:[%s618_s1 + $0x18] sm:$0xff]   ;;  %v515_v4 = vld [vmem:[%s619_s0] sm:$0xff]   ;;  %v512_v7 = vld [vmem:[%s618_s1 + $0x28] sm:$0xff]  }
   0x3   :  { %460 = vmatpush3.bf16.msra.mxu0 %v507_v0  ;;  %499 = vmatpush3.bf16.msra.mxu1 %v507_v0  ;;  %v516_v5 = vld [vmem:[%s619_s0 + $0x20] sm:$0xff]   ;;  %v513_v8 = vld [vmem:[%s618_s1 + $0x30] sm:$0xff]   ;;  %v514_v9 = vld [vmem:[%s618_s1 + $0x38] sm:$0xff]  }
   0x4   :  { %461 = vmatprep.subr.bf16.mxu0 %v508_v1  ;;  %492 = vmatprep.subr.bf16.mxu1 %v508_v1  ;;  %v511_v6 = vld [vmem:[%s618_s1 + $0x20] sm:$0xff]   ;;  %v517_v10 = vld [vmem:[%s619_s0 + $0x8] sm:$0xff]   ;;  %v519_v12 = vld [vmem:[%s619_s0 + $0x10] sm:$0xff]  }
   0x5   :  { %475 = vmatprep.mubr.bf16.mxu0 %v515_v4  ;;  %483 = vmatprep.mubr.bf16.mxu1 %v516_v5  ;;  %v518_v11 = vld [vmem:[%s619_s0 + $0x28] sm:$0xff]   ;;  %v520_v13 = vld [vmem:[%s619_s0 + $0x30] sm:$0xff]   ;;  %v521_v14 = vld [vmem:[%s619_s0 + $0x18] sm:$0xff]  }
   0x6   :  { %v522_v15 = vld [vmem:[%s619_s0 + $0x38] sm:$0xff]   ;;  %v347_v16 = vld [vmem:[%s620_s2] ss:$0 sm:$0xff] }
   0x7   :  { %462 = vmatpush3.bf16.msra.mxu0 %v508_v1  ;;  %500 = vmatpush3.bf16.msra.mxu1 %v508_v1 }
   0x8   :  { %463 = vmatprep.subr.bf16.mxu0 %v509_v2  ;;  %493 = vmatprep.subr.bf16.mxu1 %v509_v2 }
   0xb   :  { %464 = vmatpush3.bf16.msra.mxu0 %v509_v2  ;;  %501 = vmatpush3.bf16.msra.mxu1 %v509_v2 }
   0xc   :  { %465 = vmatprep.subr.bf16.mxu0 %v510_v3  ;;  %494 = vmatprep.subr.bf16.mxu1 %v510_v3 }
   0xf   :  { %466 = vmatpush3.bf16.msra.mxu0 %v510_v3  ;;  %502 = vmatpush3.bf16.msra.mxu1 %v510_v3 }
  0x10   :  { %467 = vmatprep.subr.bf16.mxu0 %v511_v6  ;;  %495 = vmatprep.subr.bf16.mxu1 %v511_v6 }
  0x13   :  { %468 = vmatpush3.bf16.msra.mxu0 %v511_v6  ;;  %503 = vmatpush3.bf16.msra.mxu1 %v511_v6 }
  0x14   :  { %469 = vmatprep.subr.bf16.mxu0 %v512_v7  ;;  %496 = vmatprep.subr.bf16.mxu1 %v512_v7 }
  0x17   :  { %470 = vmatpush3.bf16.msra.mxu0 %v512_v7  ;;  %504 = vmatpush3.bf16.msra.mxu1 %v512_v7 }
  0x18   :  { %471 = vmatprep.subr.bf16.mxu0 %v513_v8  ;;  %497 = vmatprep.subr.bf16.mxu1 %v513_v8 }
  0x1b   :  { %472 = vmatpush3.bf16.msra.mxu0 %v513_v8  ;;  %505 = vmatpush3.bf16.msra.mxu1 %v513_v8 }
  0x1c   :  { %473 = vmatprep.subr.bf16.mxu0 %v514_v9  ;;  %498 = vmatprep.subr.bf16.mxu1 %v514_v9 }
  0x1f   :  { %474 = vmatpush3.bf16.msra.mxu0 %v514_v9  ;;  %506 = vmatpush3.bf16.msra.mxu1 %v514_v9 }
  0x22   :  { %476 = vmatmul.mubr.bf16.vlgmr.msra.gmra.mrb[0].mxu0 %v517_v10  ;;  %484 = vmatmul.mubr.bf16.vlgmr.msra.gmra.mrb[0].mxu1 %v518_v11 }
  0x23   :  { %479 = vmatprep.mubr.bf16.mxu0 %v519_v12  ;;  %487 = vmatprep.mubr.bf16.mxu1 %v520_v13 }
  0x2a   :  { %480 = vmatmul.mubr.bf16.gmra.mrb[4].mxu0 %v521_v14  ;;  %488 = vmatmul.mubr.bf16.gmra.mrb[4].mxu1 %v522_v15 }
  0xf5   :  { %v477_v17 = vpop.f32.mrb[0].mxu0  ;;  %v485_v18 = vpop.f32.mrb[0].mxu1 }
  0xf6   :  { %v193_v19 = vadd.f32 %v477_v17, %v347_v16  ;;  %v225_v20 = vadd.f32 %v485_v18, %v347_v16  ;;  %v184_v21 = vpop.f32.mrb[1].mxu0  ;;  %v216_v22 = vpop.f32.mrb[1].mxu1 }
  0xf7   :  { %v185_v23 = vadd.f32 %v347_v16, %v184_v21  ;;  %v217_v24 = vadd.f32 %v347_v16, %v216_v22  ;;  %v478_v25 = vpop.f32.mrb[2].mxu0  ;;  %v486_v26 = vpop.f32.mrb[2].mxu1 }
  0xf8   :  { %v196_v27 = vadd.f32 %v478_v25, %v347_v16  ;;  %v228_v28 = vadd.f32 %v486_v26, %v347_v16  ;;  %v187_v29 = vpop.f32.mrb[3].mxu0  ;;  %v219_v30 = vpop.f32.mrb[3].mxu1  ;;  %v249_v33 = vmax.f32 %v193_v19, 0.0  ;;  %v257_v34 = vmax.f32 %v225_v20, 0.0 }
  0xf9   :  { %v188_v31 = vadd.f32 %v347_v16, %v187_v29  ;;  %v220_v32 = vadd.f32 %v347_v16, %v219_v30  ;;  %v247_v37 = vmax.f32 %v185_v23, 0.0  ;;  %v255_v38 = vmax.f32 %v217_v24, 0.0 }
  0xfa   :  { %v250_v35 = vmax.f32 %v196_v27, 0.0  ;;  %v258_v36 = vmax.f32 %v228_v28, 0.0 }
  0xfb   :  { %v248_v39 = vmax.f32 %v188_v31, 0.0  ;;  %v256_v40 = vmax.f32 %v220_v32, 0.0 }
  0xfc   :  { %v404_v41 = vpack.c.bf16 %v250_v35, %v249_v33  ;;  %v424_v42 = vpack.c.bf16 %v258_v36, %v257_v34 }
  0xfd   :  { %v399_v43 = vpack.c.bf16 %v248_v39, %v247_v37  ;;  %v419_v44 = vpack.c.bf16 %v256_v40, %v255_v38  ;;  %v481_v45 = vpop.f32.mrb[4].mxu0  ;;  %v489_v46 = vpop.f32.mrb[4].mxu1 }
  0xfe   :  { %436 = vst [vmem:[%s621_s3 + $0x8] sm:$0xff] %v404_v41   ;;  %440 = vst [vmem:[%s621_s3 + $0x28] sm:$0xff] %v424_v42   ;;  %v209_v47 = vadd.f32 %v481_v45, %v347_v16  ;;  %v241_v48 = vadd.f32 %v489_v46, %v347_v16  ;;  %v200_v49 = vpop.f32.mrb[5].mxu0  ;;  %v232_v50 = vpop.f32.mrb[5].mxu1 }
  0xff   :  { %400 = vst [vmem:[%s621_s3] sm:$0xff] %v399_v43   ;;  %439 = vst [vmem:[%s621_s3 + $0x20] sm:$0xff] %v419_v44   ;;  %v201_v51 = vadd.f32 %v347_v16, %v200_v49  ;;  %v233_v52 = vadd.f32 %v347_v16, %v232_v50  ;;  %v482_v53 = vpop.f32.mrb[6].mxu0  ;;  %v490_v54 = vpop.f32.mrb[6].mxu1 }
 0x100   :  { %v212_v55 = vadd.f32 %v482_v53, %v347_v16  ;;  %v244_v56 = vadd.f32 %v490_v54, %v347_v16  ;;  %v203_v57 = vpop.f32.mrb[7].mxu0  ;;  %v235_v58 = vpop.f32.mrb[7].mxu1  ;;  %v253_v61 = vmax.f32 %v209_v47, 0.0  ;;  %v261_v62 = vmax.f32 %v241_v48, 0.0 }
 0x101   :  { %v204_v59 = vadd.f32 %v347_v16, %v203_v57  ;;  %v236_v60 = vadd.f32 %v347_v16, %v235_v58  ;;  %v251_v1 = vmax.f32 %v201_v51, 0.0  ;;  %v259_v2 = vmax.f32 %v233_v52, 0.0 }
 0x102   :  { %v254_v63 = vmax.f32 %v212_v55, 0.0  ;;  %v262_v0 = vmax.f32 %v244_v56, 0.0 }
 0x103   :  { %v252_v3 = vmax.f32 %v204_v59, 0.0  ;;  %v260_v4 = vmax.f32 %v236_v60, 0.0 }
 0x104   :  { %v414_v5 = vpack.c.bf16 %v254_v63, %v253_v61  ;;  %v434_v6 = vpack.c.bf16 %v262_v0, %v261_v62 }
 0x105   :  { %v409_v7 = vpack.c.bf16 %v252_v3, %v251_v1  ;;  %v429_v8 = vpack.c.bf16 %v260_v4, %v259_v2 }
 0x106   :  { %438 = vst [vmem:[%s621_s3 + $0x18] sm:$0xff] %v414_v5   ;;  %442 = vst [vmem:[%s621_s3 + $0x38] sm:$0xff] %v434_v6  }
 0x107   :  { %437 = vst [vmem:[%s621_s3 + $0x10] sm:$0xff] %v409_v7   ;;  %441 = vst [vmem:[%s621_s3 + $0x30] sm:$0xff] %v429_v8  }

// kernel: lamp_signature_encoder.7
= control target key start
LH: loop header
LB: loop body
LE: loop exit
PB: predicated region body
PF: predicated region fallthrough
CT: control target
= control target key end

     0   :  { %s483_s1 = inlined_call_operand.vmem [shape: bf16[128,128], index: 1, kind: input, shape index: {}]   ;;  %s484_s0 = inlined_call_operand.vmem [shape: bf16[128,128], index: 0, kind: input, shape index: {}]   ;;  %s485_s2 = inlined_call_operand.vmem [shape: f32[1,128], index: 2, kind: input, shape index: {}]   ;;  %s486_s3 = inlined_call_operand.vmem [shape: f32[128,128], index: 3, kind: output, shape index: {}]  }
   0x1   :  { %v348_v0 = vld [vmem:[%s483_s1] sm:$0xff]   ;;  %v349_v1 = vld [vmem:[%s483_s1 + $0x8] sm:$0xff]   ;;  %v350_v2 = vld [vmem:[%s483_s1 + $0x10] sm:$0xff]  }
   0x2   :  { %300 = vmatprep.subr.bf16.mxu0 %v348_v0  ;;  %332 = vmatprep.subr.bf16.mxu1 %v348_v0  ;;  %v351_v3 = vld [vmem:[%s483_s1 + $0x18] sm:$0xff]   ;;  %v356_v4 = vld [vmem:[%s484_s0] sm:$0xff]   ;;  %v353_v7 = vld [vmem:[%s483_s1 + $0x28] sm:$0xff]  }
   0x3   :  { %301 = vmatpush3.bf16.msra.mxu0 %v348_v0  ;;  %340 = vmatpush3.bf16.msra.mxu1 %v348_v0  ;;  %v357_v5 = vld [vmem:[%s484_s0 + $0x20] sm:$0xff]   ;;  %v354_v8 = vld [vmem:[%s483_s1 + $0x30] sm:$0xff]   ;;  %v355_v9 = vld [vmem:[%s483_s1 + $0x38] sm:$0xff]  }
   0x4   :  { %302 = vmatprep.subr.bf16.mxu0 %v349_v1  ;;  %333 = vmatprep.subr.bf16.mxu1 %v349_v1  ;;  %v352_v6 = vld [vmem:[%s483_s1 + $0x20] sm:$0xff]   ;;  %v358_v10 = vld [vmem:[%s484_s0 + $0x8] sm:$0xff]   ;;  %v360_v12 = vld [vmem:[%s484_s0 + $0x10] sm:$0xff]  }
   0x5   :  { %316 = vmatprep.mubr.bf16.mxu0 %v356_v4  ;;  %324 = vmatprep.mubr.bf16.mxu1 %v357_v5  ;;  %v359_v11 = vld [vmem:[%s484_s0 + $0x28] sm:$0xff]   ;;  %v361_v13 = vld [vmem:[%s484_s0 + $0x30] sm:$0xff]   ;;  %v362_v14 = vld [vmem:[%s484_s0 + $0x18] sm:$0xff]  }
   0x6   :  { %v363_v15 = vld [vmem:[%s484_s0 + $0x38] sm:$0xff]   ;;  %v267_v16 = vld [vmem:[%s485_s2] ss:$0 sm:$0xff] }
   0x7   :  { %303 = vmatpush3.bf16.msra.mxu0 %v349_v1  ;;  %341 = vmatpush3.bf16.msra.mxu1 %v349_v1 }
   0x8   :  { %304 = vmatprep.subr.bf16.mxu0 %v350_v2  ;;  %334 = vmatprep.subr.bf16.mxu1 %v350_v2 }
   0xb   :  { %305 = vmatpush3.bf16.msra.mxu0 %v350_v2  ;;  %342 = vmatpush3.bf16.msra.mxu1 %v350_v2 }
   0xc   :  { %306 = vmatprep.subr.bf16.mxu0 %v351_v3  ;;  %335 = vmatprep.subr.bf16.mxu1 %v351_v3 }
   0xf   :  { %307 = vmatpush3.bf16.msra.mxu0 %v351_v3  ;;  %343 = vmatpush3.bf16.msra.mxu1 %v351_v3 }
  0x10   :  { %308 = vmatprep.subr.bf16.mxu0 %v352_v6  ;;  %336 = vmatprep.subr.bf16.mxu1 %v352_v6 }
  0x13   :  { %309 = vmatpush3.bf16.msra.mxu0 %v352_v6  ;;  %344 = vmatpush3.bf16.msra.mxu1 %v352_v6 }
  0x14   :  { %310 = vmatprep.subr.bf16.mxu0 %v353_v7  ;;  %337 = vmatprep.subr.bf16.mxu1 %v353_v7 }
  0x17   :  { %311 = vmatpush3.bf16.msra.mxu0 %v353_v7  ;;  %345 = vmatpush3.bf16.msra.mxu1 %v353_v7 }
  0x18   :  { %312 = vmatprep.subr.bf16.mxu0 %v354_v8  ;;  %338 = vmatprep.subr.bf16.mxu1 %v354_v8 }
  0x1b   :  { %313 = vmatpush3.bf16.msra.mxu0 %v354_v8  ;;  %346 = vmatpush3.bf16.msra.mxu1 %v354_v8 }
  0x1c   :  { %314 = vmatprep.subr.bf16.mxu0 %v355_v9  ;;  %339 = vmatprep.subr.bf16.mxu1 %v355_v9 }
  0x1f   :  { %315 = vmatpush3.bf16.msra.mxu0 %v355_v9  ;;  %347 = vmatpush3.bf16.msra.mxu1 %v355_v9 }
  0x22   :  { %317 = vmatmul.mubr.bf16.vlgmr.msra.gmra.mrb[0].mxu0 %v358_v10  ;;  %325 = vmatmul.mubr.bf16.vlgmr.msra.gmra.mrb[0].mxu1 %v359_v11 }
  0x23   :  { %320 = vmatprep.mubr.bf16.mxu0 %v360_v12  ;;  %328 = vmatprep.mubr.bf16.mxu1 %v361_v13 }
  0x2a   :  { %321 = vmatmul.mubr.bf16.gmra.mrb[4].mxu0 %v362_v14  ;;  %329 = vmatmul.mubr.bf16.gmra.mrb[4].mxu1 %v363_v15 }
  0xf5   :  { %v318_v17 = vpop.f32.mrb[0].mxu0  ;;  %v326_v18 = vpop.f32.mrb[0].mxu1 }
  0xf6   :  { %v193_v19 = vadd.f32 %v318_v17, %v267_v16  ;;  %v225_v20 = vadd.f32 %v326_v18, %v267_v16  ;;  %v184_v21 = vpop.f32.mrb[1].mxu0  ;;  %v216_v22 = vpop.f32.mrb[1].mxu1 }
  0xf7   :  { %v185_v23 = vadd.f32 %v267_v16, %v184_v21  ;;  %v217_v24 = vadd.f32 %v267_v16, %v216_v22  ;;  %v319_v25 = vpop.f32.mrb[2].mxu0  ;;  %v327_v26 = vpop.f32.mrb[2].mxu1 }
  0xf8   :  { %249 = vst [vmem:[%s486_s3 + $0x10] sm:$0xff] %v193_v19  ;;  %257 = vst [vmem:[%s486_s3 + $0x50] sm:$0xff] %v225_v20  ;;  %v196_v27 = vadd.f32 %v319_v25, %v267_v16  ;;  %v228_v28 = vadd.f32 %v327_v26, %v267_v16  ;;  %v187_v29 = vpop.f32.mrb[3].mxu0  ;;  %v219_v30 = vpop.f32.mrb[3].mxu1 }
  0xf9   :  { %247 = vst [vmem:[%s486_s3] sm:$0xff] %v185_v23  ;;  %255 = vst [vmem:[%s486_s3 + $0x40] sm:$0xff] %v217_v24  ;;  %v188_v31 = vadd.f32 %v267_v16, %v187_v29  ;;  %v220_v32 = vadd.f32 %v267_v16, %v219_v30 }
  0xfa   :  { %250 = vst [vmem:[%s486_s3 + $0x18] sm:$0xff] %v196_v27  ;;  %258 = vst [vmem:[%s486_s3 + $0x58] sm:$0xff] %v228_v28 }
  0xfb   :  { %248 = vst [vmem:[%s486_s3 + $0x8] sm:$0xff] %v188_v31  ;;  %256 = vst [vmem:[%s486_s3 + $0x48] sm:$0xff] %v220_v32 }
  0xfd   :  { %v322_v33 = vpop.f32.mrb[4].mxu0  ;;  %v330_v34 = vpop.f32.mrb[4].mxu1 }
  0xfe   :  { %v209_v35 = vadd.f32 %v322_v33, %v267_v16  ;;  %v241_v36 = vadd.f32 %v330_v34, %v267_v16  ;;  %v200_v37 = vpop.f32.mrb[5].mxu0  ;;  %v232_v38 = vpop.f32.mrb[5].mxu1 }
  0xff   :  { %v201_v39 = vadd.f32 %v267_v16, %v200_v37  ;;  %v233_v40 = vadd.f32 %v267_v16, %v232_v38  ;;  %v323_v41 = vpop.f32.mrb[6].mxu0  ;;  %v331_v42 = vpop.f32.mrb[6].mxu1 }
 0x100   :  { %253 = vst [vmem:[%s486_s3 + $0x30] sm:$0xff] %v209_v35  ;;  %261 = vst [vmem:[%s486_s3 + $0x70] sm:$0xff] %v241_v36  ;;  %v212_v43 = vadd.f32 %v323_v41, %v267_v16  ;;  %v244_v44 = vadd.f32 %v331_v42, %v267_v16  ;;  %v203_v45 = vpop.f32.mrb[7].mxu0  ;;  %v235_v46 = vpop.f32.mrb[7].mxu1 }
 0x101   :  { %251 = vst [vmem:[%s486_s3 + $0x20] sm:$0xff] %v201_v39  ;;  %259 = vst [vmem:[%s486_s3 + $0x60] sm:$0xff] %v233_v40  ;;  %v204_v47 = vadd.f32 %v267_v16, %v203_v45  ;;  %v236_v48 = vadd.f32 %v267_v16, %v235_v46 }
 0x102   :  { %254 = vst [vmem:[%s486_s3 + $0x38] sm:$0xff] %v212_v43  ;;  %262 = vst [vmem:[%s486_s3 + $0x78] sm:$0xff] %v244_v44 }
 0x103   :  { %252 = vst [vmem:[%s486_s3 + $0x28] sm:$0xff] %v204_v47  ;;  %260 = vst [vmem:[%s486_s3 + $0x68] sm:$0xff] %v236_v48 }

</bundles_post_ra>
